<compile_context>
chip_gen: v7x
topology: tpu7x:2x2x1
jax: 0.10.0
libtpu: 0.0.40
codegen_flags: <defaults>
</compile_context>

<pallas_src>
import functools
import math

import jax
import jax.numpy as jnp
from jax.experimental import pallas as pl
from jax.experimental.pallas import tpu as pltpu


def _round_up(a, m):
    return ((a + m - 1) // m) * m


def _softplus_scaled(s):
    # s is already beta * x (beta folded into the preceding weights/bias).
    # Returns beta * Softplus_{beta=100}(x) = log1p(exp(s)), with PyTorch's
    # threshold-20 linear branch; the 1/beta factor is folded into the NEXT
    # layer's weights.  min(s, 20) keeps the not-taken branch finite
    # (including for zero-padded batch lanes).
    safe = jnp.minimum(s, 20.0)
    return jnp.where(s > 20.0, s, jnp.log1p(jnp.exp(safe)))


def _make_kernel(n_linear):
    """Kernel refs: (x_t, B2pi, W1_cos, W1_sin, b1, W2, b2, ..., Wn, bn, out_t).

    Orientation (batch on the lane axis):
      x_t   : (indim,  bn)
      B2pi  : (mapdim, indim)   -- Fourier buffer pre-multiplied by 2*pi
      Wk    : (out_k,  in_k)    -- native PyTorch layout (pre-scaled), applied as W @ h
      bk    : (out_k,  1)       -- pre-scaled
      out_t : (outdim, bn)
    """

    def kernel(*refs):
        x_ref, b2pi_ref, w1c_ref, w1s_ref, b1_ref = refs[:5]
        o_ref = refs[-1]
        rest = refs[5:-1]  # (W2, b2, ..., Wn, bn)

        xt = x_ref[...]                                                  # (indim, bn)
        proj = jnp.dot(b2pi_ref[...], xt,
                       preferred_element_type=jnp.float32)              # (mapdim, bn)

        # First linear folded over the [cos, sin] halves -> no concatenate.
        h = (jnp.dot(w1c_ref[...], jnp.cos(proj),
                     preferred_element_type=jnp.float32)
             + jnp.dot(w1s_ref[...], jnp.sin(proj),
                       preferred_element_type=jnp.float32)
             + b1_ref[...])                                              # (arch1, bn)

        for li in range(1, n_linear):
            w = rest[2 * (li - 1)][...]        # (out, in), pre-scaled
            b = rest[2 * (li - 1) + 1][...]    # (out, 1),  pre-scaled
            h = jnp.dot(w, _softplus_scaled(h),
                        preferred_element_type=jnp.float32) + b

        o_ref[...] = h.astype(o_ref.dtype)

    return kernel


def pinn_forward(x, B, weights, biases, block_n=2048):
    """Pallas forward pass of PINN_Architecture.

    x       : (N, indim)
    B       : (mapdim, indim)            Fourier buffer
    weights : list of (out_i, in_i)      PyTorch Linear.weight layout
    biases  : list of (1, out_i)         PyTorch-style biases
    returns : (N, outdim)
    """
    N, indim = x.shape
    mapdim = B.shape[0]
    n_linear = len(weights)
    outdim = weights[-1].shape[0]
    dtype = x.dtype

    # ---- Lane-tile / grid selection ------------------------------------------
    # Big tiles to amortize the ~0.35us per-grid-step overhead; at least two
    # (and an even number of) "parallel" steps so v7x's two TensorCores both
    # get work whenever the batch is large enough.
    n_rounded = _round_up(N, 128)
    bn = min(_round_up(block_n, 128), n_rounded)
    steps = -(-n_rounded // bn)
    if n_rounded >= 256:
        if steps < 2:
            steps = 2
        if steps % 2:
            steps += 1
        bn = _round_up(-(-n_rounded // steps), 128)
    n_pad = steps * bn
    grid = (steps,)

    # Transposed, zero-padded input: (indim, n_pad).  Fuses under jax.jit.
    x_t = jnp.zeros((indim, n_pad), dtype).at[:, :N].set(x.T)

    # ---- Constant folding into parameters -------------------------------------
    # * 2*pi folded into the Fourier buffer.
    # * Softplus beta=100 / (1/beta)=0.01 folded into adjacent layers:
    #     W'_k = W_k * (100 if k < n-1) * (0.01 if k > 0)
    #     b'_k = b_k * (100 if k < n-1)
    #   so in-kernel softplus needs no elementwise scaling.
    B2pi = (2.0 * math.pi) * B

    scaled_w, scaled_b = [], []
    for k, (w, b) in enumerate(zip(weights, biases)):
        s_w = (100.0 if k < n_linear - 1 else 1.0) * (0.01 if k > 0 else 1.0)
        s_b = 100.0 if k < n_linear - 1 else 1.0
        scaled_w.append(w * s_w)
        scaled_b.append(jnp.reshape(b, (-1, 1)) * s_b)   # column vectors -> lane broadcast

    w1 = scaled_w[0]
    w1_cos = w1[:, :mapdim]
    w1_sin = w1[:, mapdim:]

    args = [x_t, B2pi, w1_cos, w1_sin, scaled_b[0]]
    in_specs = [
        pl.BlockSpec((indim, bn), lambda i: (0, i)),      # x: lane-tiled batch
        pl.BlockSpec(B2pi.shape, lambda i: (0, 0)),       # params: fully VMEM-resident
        pl.BlockSpec(w1_cos.shape, lambda i: (0, 0)),
        pl.BlockSpec(w1_sin.shape, lambda i: (0, 0)),
        pl.BlockSpec(scaled_b[0].shape, lambda i: (0, 0)),
    ]
    for w, b in zip(scaled_w[1:], scaled_b[1:]):
        args += [w, b]
        in_specs += [pl.BlockSpec(w.shape, lambda i: (0, 0)),
                     pl.BlockSpec(b.shape, lambda i: (0, 0))]

    out_spec = pl.BlockSpec((outdim, bn), lambda i: (0, i))

    # Advisory cost hint (kernel is EUP-bound; flops/bytes are tiny).
    dims = [2 * mapdim] + [w.shape[0] for w in weights]
    flops = 2 * N * (indim * mapdim
                     + sum(a * b for a, b in zip(dims[:-1], dims[1:])))
    transcendentals = N * (2 * mapdim + 2 * sum(dims[1:-1]))
    param_bytes = sum(int(a.size) * a.dtype.itemsize for a in args[1:])
    bytes_accessed = int(N * (indim + outdim) * x.dtype.itemsize + param_bytes)
    cost = pl.CostEstimate(flops=int(flops),
                           transcendentals=int(transcendentals),
                           bytes_accessed=bytes_accessed)

    out_t = pl.pallas_call(
        _make_kernel(n_linear),
        out_shape=jax.ShapeDtypeStruct((outdim, n_pad), dtype),
        grid=grid,
        in_specs=in_specs,
        out_specs=out_spec,
        compiler_params=pltpu.CompilerParams(
            dimension_semantics=("parallel",)),
        cost_estimate=cost,
    )(*args)

    return out_t[:, :N].T


# --------------------------------------------------------------------------- #
# Reference / parameter helpers (mirror the PyTorch module)
# --------------------------------------------------------------------------- #

def _softplus_beta100(x):
    # torch.nn.Softplus(beta=100, threshold=20): y = log1p(exp(100*x)) / 100,
    # linear (y = x) where 100*x > 20.
    bx = 100.0 * x
    safe = jnp.minimum(bx, 20.0)
    return jnp.where(bx > 20.0, x, jnp.log1p(jnp.exp(safe)) * 0.01)


def init_params(key, architecture, fourier_scale, fourier_mapdim, indim):
    """Deterministic synthetic parameters matching the PyTorch module's shapes."""
    n_linear = len(architecture) - 1
    keys = jax.random.split(key, 1 + 2 * n_linear)
    kB, lin_keys = keys[0], keys[1:]

    # FourierFeatures buffer: B ~ N(0,1) * scale**2, shape (mapdim, indim)  (as in the spec)
    B = jax.random.normal(kB, (fourier_mapdim, indim), jnp.float32) * (fourier_scale ** 2)

    # Linear layers: first takes 2*mapdim inputs, then architecture[1:] widths.
    dims = [2 * fourier_mapdim] + list(architecture[1:])
    weights, biases = [], []
    for li, (fan_in, fan_out) in enumerate(zip(dims[:-1], dims[1:])):
        bound = 1.0 / math.sqrt(fan_in)
        w = jax.random.uniform(lin_keys[2 * li], (fan_out, fan_in),
                               jnp.float32, minval=-bound, maxval=bound)
        b = jax.random.uniform(lin_keys[2 * li + 1], (1, fan_out),
                               jnp.float32, minval=-bound, maxval=bound)
        weights.append(w)
        biases.append(b)
    return B, weights, biases


def reference_forward(x, B, weights, biases):
    """Plain-JAX reference mirroring the PyTorch forward exactly."""
    proj = 2.0 * math.pi * x @ B.T
    h = jnp.concatenate([jnp.cos(proj), jnp.sin(proj)], axis=-1)
    for li, (w, b) in enumerate(zip(weights, biases)):
        if li > 0:
            h = _softplus_beta100(h)
        h = h @ w.T + b
    return h


if __name__ == "__main__":
    # Small shapes consistent with the module:
    #   indim=2 (e.g. (x, t) PINN coords), fourier_mapdim=16 -> Fourier outdim=32,
    #   architecture=[2, 32, 32, 1].  N=200 exercises the padding / multi-step
    #   grid path (grid=(2,)).
    indim = 2
    fourier_scale = 1.0
    fourier_mapdim = 16
    architecture = [indim, 32, 32, 1]
    N = 200

    key = jax.random.PRNGKey(0)
    kx, kp = jax.random.split(key)
    x = jax.random.normal(kx, (N, indim), jnp.float32)

    B, weights, biases = init_params(kp, architecture, fourier_scale, fourier_mapdim, indim)

    # jit the wrapper so the pad/transpose and final slice fuse with the kernel.
    fwd = jax.jit(functools.partial(pinn_forward, block_n=2048))
    out = jax.block_until_ready(fwd(x, B, weights, biases))

    ref = reference_forward(x, B, weights, biases)
    assert out.shape == (N, architecture[-1])
    assert jnp.allclose(out, ref, atol=1e-4, rtol=1e-4), "mismatch vs. reference"

    print("KERNEL_OK")
</pallas_src>

<mosaic_0001>
module attributes {stable_mosaic.version = 11 : i64} {
  func.func @kernel(%arg0: i32, %arg1: memref<2x128xf32, #tpu.memory_space<vmem>>, %arg2: memref<16x2xf32, #tpu.memory_space<vmem>>, %arg3: memref<32x16xf32, #tpu.memory_space<vmem>>, %arg4: memref<32x16xf32, #tpu.memory_space<vmem>>, %arg5: memref<32x1xf32, #tpu.memory_space<vmem>>, %arg6: memref<32x32xf32, #tpu.memory_space<vmem>>, %arg7: memref<32x1xf32, #tpu.memory_space<vmem>>, %arg8: memref<1x32xf32, #tpu.memory_space<vmem>>, %arg9: memref<1x1xf32, #tpu.memory_space<vmem>>, %arg10: memref<1x128xf32, #tpu.memory_space<vmem>>) attributes {dimension_semantics = [#tpu.dimension_semantics<parallel>], iteration_bounds = array<i64: 2>, scalar_prefetch = 0 : i64, scratch_operands = 0 : i64, tpu.core_type = #tpu.core_type<tc>, window_params = [{transform_indices = @transform_0, window_bounds = array<i64: 2, 128>}, {pipeline_mode = #tpu.pipeline_mode<synchronous>, transform_indices = @transform_1, window_bounds = array<i64: 16, 2>}, {pipeline_mode = #tpu.pipeline_mode<synchronous>, transform_indices = @transform_2, window_bounds = array<i64: 32, 16>}, {pipeline_mode = #tpu.pipeline_mode<synchronous>, transform_indices = @transform_3, window_bounds = array<i64: 32, 16>}, {pipeline_mode = #tpu.pipeline_mode<synchronous>, transform_indices = @transform_4, window_bounds = array<i64: 32, 1>}, {pipeline_mode = #tpu.pipeline_mode<synchronous>, transform_indices = @transform_5, window_bounds = array<i64: 32, 32>}, {pipeline_mode = #tpu.pipeline_mode<synchronous>, transform_indices = @transform_6, window_bounds = array<i64: 32, 1>}, {pipeline_mode = #tpu.pipeline_mode<synchronous>, transform_indices = @transform_7, window_bounds = array<i64: 1, 32>}, {pipeline_mode = #tpu.pipeline_mode<synchronous>, transform_indices = @transform_8, window_bounds = array<i64: 1, 1>}, {transform_indices = @transform_9, window_bounds = array<i64: 1, 128>}]} {
    %c0 = arith.constant 0 : index
    %c0_0 = arith.constant 0 : index
    %0 = vector.load %arg1[%c0, %c0_0] : memref<2x128xf32, #tpu.memory_space<vmem>>, vector<2x128xf32>
    %c0_1 = arith.constant 0 : index
    %c0_2 = arith.constant 0 : index
    %1 = vector.load %arg2[%c0_1, %c0_2] : memref<16x2xf32, #tpu.memory_space<vmem>>, vector<16x2xf32>
    %cst = arith.constant dense<0.000000e+00> : vector<16x128xf32>
    %2 = tpu.matmul %1, %0, %cst {dimension_numbers = #tpu.dot_dimension_numbers<[1], [0], [0], [1], [0, 0, 1, 1], [], []>} : vector<16x2xf32>, vector<2x128xf32>, vector<16x128xf32> -> vector<16x128xf32>
    %c0_3 = arith.constant 0 : index
    %c0_4 = arith.constant 0 : index
    %3 = vector.load %arg3[%c0_3, %c0_4] : memref<32x16xf32, #tpu.memory_space<vmem>>, vector<32x16xf32>
    %4 = math.cos %2 : vector<16x128xf32>
    %cst_5 = arith.constant dense<0.000000e+00> : vector<32x128xf32>
    %5 = tpu.matmul %3, %4, %cst_5 {dimension_numbers = #tpu.dot_dimension_numbers<[1], [0], [0], [1], [0, 0, 1, 1], [], []>} : vector<32x16xf32>, vector<16x128xf32>, vector<32x128xf32> -> vector<32x128xf32>
    %c0_6 = arith.constant 0 : index
    %c0_7 = arith.constant 0 : index
    %6 = vector.load %arg4[%c0_6, %c0_7] : memref<32x16xf32, #tpu.memory_space<vmem>>, vector<32x16xf32>
    %7 = math.sin %2 : vector<16x128xf32>
    %cst_8 = arith.constant dense<0.000000e+00> : vector<32x128xf32>
    %8 = tpu.matmul %6, %7, %cst_8 {dimension_numbers = #tpu.dot_dimension_numbers<[1], [0], [0], [1], [0, 0, 1, 1], [], []>} : vector<32x16xf32>, vector<16x128xf32>, vector<32x128xf32> -> vector<32x128xf32>
    %9 = arith.addf %5, %8 : vector<32x128xf32>
    %c0_9 = arith.constant 0 : index
    %c0_10 = arith.constant 0 : index
    %10 = vector.load %arg5[%c0_9, %c0_10] : memref<32x1xf32, #tpu.memory_space<vmem>>, vector<32x1xf32>
    %11 = vector.broadcast %10 : vector<32x1xf32> to vector<32x128xf32>
    %12 = arith.addf %9, %11 : vector<32x128xf32>
    %c0_11 = arith.constant 0 : index
    %c0_12 = arith.constant 0 : index
    %13 = vector.load %arg6[%c0_11, %c0_12] : memref<32x32xf32, #tpu.memory_space<vmem>>, vector<32x32xf32>
    %c0_13 = arith.constant 0 : index
    %c0_14 = arith.constant 0 : index
    %14 = vector.load %arg7[%c0_13, %c0_14] : memref<32x1xf32, #tpu.memory_space<vmem>>, vector<32x1xf32>
    %cst_15 = arith.constant 2.000000e+01 : f32
    %15 = vector.broadcast %cst_15 : f32 to vector<32x128xf32>
    %16 = arith.minimumf %12, %15 : vector<32x128xf32>
    %cst_16 = arith.constant 2.000000e+01 : f32
    %17 = vector.broadcast %cst_16 : f32 to vector<32x128xf32>
    %18 = arith.cmpf ogt, %12, %17 : vector<32x128xf32>
    %19 = math.exp %16 : vector<32x128xf32>
    %20 = math.log1p %19 : vector<32x128xf32>
    %21 = arith.select %18, %12, %20 : vector<32x128xi1>, vector<32x128xf32>
    %cst_17 = arith.constant dense<0.000000e+00> : vector<32x128xf32>
    %22 = tpu.matmul %13, %21, %cst_17 {dimension_numbers = #tpu.dot_dimension_numbers<[1], [0], [0], [1], [0, 0, 1, 1], [], []>} : vector<32x32xf32>, vector<32x128xf32>, vector<32x128xf32> -> vector<32x128xf32>
    %23 = vector.broadcast %14 : vector<32x1xf32> to vector<32x128xf32>
    %24 = arith.addf %22, %23 : vector<32x128xf32>
    %c0_18 = arith.constant 0 : index
    %c0_19 = arith.constant 0 : index
    %25 = vector.load %arg8[%c0_18, %c0_19] : memref<1x32xf32, #tpu.memory_space<vmem>>, vector<1x32xf32>
    %c0_20 = arith.constant 0 : index
    %c0_21 = arith.constant 0 : index
    %26 = vector.load %arg9[%c0_20, %c0_21] : memref<1x1xf32, #tpu.memory_space<vmem>>, vector<1x1xf32>
    %cst_22 = arith.constant 2.000000e+01 : f32
    %27 = vector.broadcast %cst_22 : f32 to vector<32x128xf32>
    %28 = arith.minimumf %24, %27 : vector<32x128xf32>
    %cst_23 = arith.constant 2.000000e+01 : f32
    %29 = vector.broadcast %cst_23 : f32 to vector<32x128xf32>
    %30 = arith.cmpf ogt, %24, %29 : vector<32x128xf32>
    %31 = math.exp %28 : vector<32x128xf32>
    %32 = math.log1p %31 : vector<32x128xf32>
    %33 = arith.select %30, %24, %32 : vector<32x128xi1>, vector<32x128xf32>
    %cst_24 = arith.constant dense<0.000000e+00> : vector<1x128xf32>
    %34 = tpu.matmul %25, %33, %cst_24 {dimension_numbers = #tpu.dot_dimension_numbers<[1], [0], [0], [1], [0, 0, 1, 1], [], []>} : vector<1x32xf32>, vector<32x128xf32>, vector<1x128xf32> -> vector<1x128xf32>
    %35 = vector.broadcast %26 : vector<1x1xf32> to vector<1x128xf32>
    %36 = arith.addf %34, %35 : vector<1x128xf32>
    %c0_25 = arith.constant 0 : index
    %c0_26 = arith.constant 0 : index
    %37 = vector.load %arg10[%c0_25, %c0_26] : memref<1x128xf32, #tpu.memory_space<vmem>>, vector<1x128xf32>
    tpu.vector_store %arg10[%c0_25, %c0_26], %36 {strides = array<i32>} : memref<1x128xf32, #tpu.memory_space<vmem>>, vector<1x128xf32>,
    return
  }
  func.func @transform_0(%arg0: i32) -> (i32, i32) {
    %c0_i32 = arith.constant 0 : i32
    %c0_i32_0 = arith.constant 0 : i32
    return %c0_i32, %arg0 : i32, i32
  }
  func.func @transform_1(%arg0: i32) -> (i32, i32) {
    %c0_i32 = arith.constant 0 : i32
    %c0_i32_0 = arith.constant 0 : i32
    %c0_i32_1 = arith.constant 0 : i32
    return %c0_i32, %c0_i32_0 : i32, i32
  }
  func.func @transform_2(%arg0: i32) -> (i32, i32) {
    %c0_i32 = arith.constant 0 : i32
    %c0_i32_0 = arith.constant 0 : i32
    %c0_i32_1 = arith.constant 0 : i32
    return %c0_i32, %c0_i32_0 : i32, i32
  }
  func.func @transform_3(%arg0: i32) -> (i32, i32) {
    %c0_i32 = arith.constant 0 : i32
    %c0_i32_0 = arith.constant 0 : i32
    %c0_i32_1 = arith.constant 0 : i32
    return %c0_i32, %c0_i32_0 : i32, i32
  }
  func.func @transform_4(%arg0: i32) -> (i32, i32) {
    %c0_i32 = arith.constant 0 : i32
    %c0_i32_0 = arith.constant 0 : i32
    %c0_i32_1 = arith.constant 0 : i32
    return %c0_i32, %c0_i32_0 : i32, i32
  }
  func.func @transform_5(%arg0: i32) -> (i32, i32) {
    %c0_i32 = arith.constant 0 : i32
    %c0_i32_0 = arith.constant 0 : i32
    %c0_i32_1 = arith.constant 0 : i32
    return %c0_i32, %c0_i32_0 : i32, i32
  }
  func.func @transform_6(%arg0: i32) -> (i32, i32) {
    %c0_i32 = arith.constant 0 : i32
    %c0_i32_0 = arith.constant 0 : i32
    %c0_i32_1 = arith.constant 0 : i32
    return %c0_i32, %c0_i32_0 : i32, i32
  }
  func.func @transform_7(%arg0: i32) -> (i32, i32) {
    %c0_i32 = arith.constant 0 : i32
    %c0_i32_0 = arith.constant 0 : i32
    %c0_i32_1 = arith.constant 0 : i32
    return %c0_i32, %c0_i32_0 : i32, i32
  }
  func.func @transform_8(%arg0: i32) -> (i32, i32) {
    %c0_i32 = arith.constant 0 : i32
    %c0_i32_0 = arith.constant 0 : i32
    %c0_i32_1 = arith.constant 0 : i32
    return %c0_i32, %c0_i32_0 : i32, i32
  }
  func.func @transform_9(%arg0: i32) -> (i32, i32) {
    %c0_i32 = arith.constant 0 : i32
    %c0_i32_0 = arith.constant 0 : i32
    return %c0_i32, %arg0 : i32, i32
  }
}

</mosaic_0001>

<bundles_post_ra>
// kernel: pinn_forward.1
= control target key start
LH: loop header
LB: loop body
LE: loop exit
PB: predicated region body
PF: predicated region fallthrough
CT: control target
= control target key end

     0   :  { %s1715_s11 = smov 0   ;;  %s1902_s0 = inlined_call_operand.vmem [shape: f32[2,256], index: 0, kind: input, shape index: {}]   ;;  %s1903_s1 = inlined_call_operand.vmem [shape: f32[16,2], index: 1, kind: input, shape index: {}]   ;;  %s1904_s2 = inlined_call_operand.vmem [shape: f32[32,16], index: 2, kind: input, shape index: {}]   ;;  %s1905_s3 = inlined_call_operand.vmem [shape: f32[32,16], index: 3, kind: input, shape index: {}]   ;;  %s1906_s4 = inlined_call_operand.vmem [shape: f32[32,1], index: 4, kind: input, shape index: {}]   ;;  %s1907_s5 = inlined_call_operand.vmem [shape: f32[32,32], index: 5, kind: input, shape index: {}]   ;;  %s1908_s6 = inlined_call_operand.vmem [shape: f32[32,1], index: 6, kind: input, shape index: {}]   ;;  %s1909_s7 = inlined_call_operand.vmem [shape: f32[1,32], index: 7, kind: input, shape index: {}]   ;;  %s1910_s8 = inlined_call_operand.<no memory space> [shape: f32[1,1], index: 8, kind: input, shape index: {}]   ;;  %s1911_s9 = inlined_call_operand.vmem [shape: f32[1,256], index: 9, kind: output, shape index: {}]  }
   0x1   :  { %v14_v0 = vstv %s1910_s8 }
   0x2   :  { %15 = vst [vmem:[#allocation2] sm:$0x1] %v14_v0 }
   0x3 LB: > { %s1432_s12 = sadd.s32 4294967295, %s1650_s11   ;;  %p1436_p0 = scmp.ge.s32.totalorder %s1650_s11, 1  ;;  %s1650_s11 = sphi %s1715_s11, %s21_s11  }
   0x4   : > { %p288_p1 = scmp.lt.s32.totalorder %s1650_s11, 3 }
   0x6   : > { %p289_p2 = pnand %p1436_p0, %p288_p1 }
   0x7   : > { %p321_p3 = scmp.lt.s32.totalorder (!%p289_p2), %s1432_s12, 1  ;;  %v329_v1 = vld [vmem:[%s1903_s1] sm:$0xff] (!%p289_p2)  ;;  %vm331_vm0 = vcmask (!%p289_p2), 15360   ;;  %vm338_vm1 = vcmask (!%p289_p2), 1041408   ;;  %v330_v3 = vld [vmem:[%s1903_s1 + $0x8] sm:$0xff] (!%p289_p2)  ;;  %vm839_vm2 = vcmask (!%p289_p2), 130048  }
   0x8   : > { %292 = sbr.rel (%p289_p2) target bundleno = 1064 (0x428), region = 56  ;;  %1502 = vmatprep.mubr.msk.f32.mxu0 (!%p289_p2), %vm331_vm0, %v329_v1  ;;  %v627_v4 = vld [vmem:[%s1905_s3] sm:$0xff] (!%p289_p2)  ;;  %v1036_v6 = vld [vmem:[%s1906_s4 + $0x10] sm:$0xff] (!%p289_p2)  ;;  %v1652_v7 = vmov (!%p289_p2), 0   ;;  %v1035_v8 = vld [vmem:[%s1906_s4 + $0x8] sm:$0xff] (!%p289_p2) }
   0x9   : > { %1509 = vmatprep.mubr.msk.f32.mxu1 (!%p289_p2), %vm839_vm2, %v627_v4  ;;  %v1034_v5 = vld [vmem:[%s1906_s4] sm:$0xff] (!%p289_p2)  ;;  %1602 = vset.pattern.permute.xlu0 (!%p289_p2), %v1652_v7  ;;  %v1037_v9 = vld [vmem:[%s1906_s4 + $0x18] sm:$0xff] (!%p289_p2)  ;;  %v1067_v11 = vld [vmem:[%s1908_s6 + $0x8] sm:$0xff] (!%p289_p2)  ;;  %v1653_v37 = vmov (!%p289_p2), 683565275  }
   0xa   : > { %1603 = vset.pattern.permute.xlu1 (!%p289_p2), %v1652_v7  ;;  %1040 = vperm.xlu0 (!%p289_p2), %1602, %v1034_v5   ;;  %v1066_v10 = vld [vmem:[%s1908_s6] sm:$0xff] (!%p289_p2)  ;;  %v1068_v12 = vld [vmem:[%s1908_s6 + $0x10] sm:$0xff] (!%p289_p2)  ;;  %v1069_v13 = vld [vmem:[%s1908_s6 + $0x18] sm:$0xff] (!%p289_p2)  ;;  %v1654_v41 = vmov (!%p289_p2), 2475754826  }
   0xb   : > { %1050 = vperm.xlu1 (!%p289_p2), %1603, %v1036_v6   ;;  %v1245_v14 = vld [vmem:[#allocation2] sm:$0x1] (!%p289_p2)  ;;  %v1655_v43 = vmov (!%p289_p2), 2131351028   ;;  %v1656_v45 = vmov (!%p289_p2), 2102212464  }
   0xc   : > { %v1657_v47 = vmov (!%p289_p2), 920167782   ;;  %v1658_v54 = vmov (!%p289_p2), 1326507024  }
   0xe   : > { %1045 = vperm.xlu0 (!%p289_p2), %1602, %v1035_v8  }
   0xf   : > { %s1913_s12 = smov (!%p321_p3, %s1432_s12), 1  ;;  %1055 = vperm.xlu1 %1603, %v1037_v9  }
  0x10   : > { %s1437_s8 = sshll.u32 %s1913_s12, 1  ;;  %s327_s24 = scalar_lea.vmem %s1911_s9, %s1913_s12 }
  0x11   : > { %s324_s17 = scalar_lea.vmem %s1902_s0, %s1437_s8 }
  0x12   : > { %v328_v2 = vld [vmem:[%s324_s17] sm:$0x3]  ;;  %1128 = vperm.xlu0 %1602, %v1066_v10  }
  0x13   : > { %1500 = vmatprep.subr.msk.mxu0 %vm338_vm1, %v328_v2  ;;  %1133 = vperm.xlu1 %1603, %v1067_v11  }
  0x14   : > { %1501 = vmatpush3.msk.msra.mxu0 %vm338_vm1, %v328_v2 }
  0x15   : > { %1503 = vmatmul.mubr.msk.f32.vlgmr.msra.gmra.mrb[0].mxu0 %vm331_vm0, %v330_v3 }
  0x16   : > { %1138 = vperm.xlu0 %1602, %v1068_v12  }
  0x17   : > { %1143 = vperm.xlu1 %1603, %v1069_v13  }
  0x1a   : > { %1304 = vperm.xlu0 %1602, %v1245_v14  }
  0xe8   : > { %v1763_v15 = vpop.f32.mrb[0].mxu0 }
  0xe9   : > { %v524_v16 = vand.u32 2147483647, %v1763_v15  ;;  %v527_v17 = vand.u32 2139095040, %v1763_v15  ;;  %v1767_v18 = vpop.f32.mrb[1].mxu0  ;;  %vm526_vm1 = vcmp.lt.s32.totalorder %v1763_v15, 0 }
  0xea   : > { %v424_v19 = vand.u32 2139095040, %v1767_v18  ;;  %v421_v22 = vand.u32 2147483647, %v1767_v18 }
  0xeb   : > { %v528_v20 = vshrl.u32 %v527_v17, 23  ;;  %v531_v21 = vand.u32 8388607, %v524_v16 }
  0xec   : > { %v425_v23 = vshrl.u32 %v424_v19, 23  ;;  %v1775_v28 = vand.u32 8388607, %v421_v22 }
  0xed   : > { %v1445_v24 = vadd.s32 4294967169, %v528_v20  ;;  %v532_v27 = vor.u32 8388608, %v531_v21 }
  0xee   : > { %v1441_v25 = vadd.s32 4294967169, %v425_v23  ;;  %v429_v35 = vor.u32 8388608, %v1775_v28 }
  0xef   : > { %v534_v26 = vadd.s32 1, %v1445_v24  ;;  %v1777_v34 = vshll.u32 %v532_v27, 8 }
  0xf0   : > { %v431_v29 = vadd.s32 1, %v1441_v25 }
  0xf1   : > { %vm535_vm3 = vcmp.gt.s32.totalorder %v534_v26, 0 }
  0xf2   : > { %v536_v30 = vsel %vm535_vm3, %v534_v26, 0  ;;  %vm432_vm4 = vcmp.gt.s32.totalorder %v431_v29, 0  ;;  %vm525_vm3 = vcmp.le.f32.partialorder %v524_v16, 0.7853982 }
  0xf3   : > { %v537_v31 = vshrl.u32 %v536_v30, 5  ;;  %v538_v32 = vand.u32 31, %v536_v30  ;;  %v433_v33 = vsel %vm432_vm4, %v431_v29, 0  ;;  %v469_v29 = vshll.u32 %v429_v35, 8 }
  0xf4   : > { %v1780_v39 = vshrl.u32 %v433_v33, 5  ;;  %v435_v40 = vand.u32 31, %v433_v33  ;;  %vm423_vm4 = vcmp.lt.s32.totalorder %v1767_v18, 0 }
  0xf5   : > { %v539_v36 = vsub.s32 32, %v538_v32  ;;  %v541_v38 = vshll.u32 %v1653_v37, %v538_v32  ;;  %v544_v42 = vshll.u32 %v1654_v41, %v538_v32  ;;  %v547_v44 = vshll.u32 %v1655_v43, %v538_v32 }
  0xf6   : > { %v550_v46 = vshll.u32 %v1656_v45, %v538_v32  ;;  %v553_v48 = vshll.u32 %v1657_v47, %v538_v32  ;;  %vm556_vm5 = vcmp.lt.s32.totalorder %v537_v31, 1  ;;  %vm557_vm6 = vcmp.lt.s32.totalorder %v537_v31, 2 }
  0xf7   : > { %v542_v49 = vshrl.u32 %v1654_v41, %v539_v36  ;;  %v545_v50 = vshrl.u32 %v1655_v43, %v539_v36  ;;  %v548_v51 = vshrl.u32 %v1656_v45, %v539_v36  ;;  %v540_v52 = vshrl.u32 %v1653_v37, %v539_v36 }
  0xf8   : > { %v551_v53 = vshrl.u32 %v1657_v47, %v539_v36  ;;  %v554_v55 = vshrl.u32 %v1658_v54, %v539_v36  ;;  %v436_v59 = vsub.s32 32, %v435_v40  ;;  %vm558_vm7 = vcmp.lt.s32.totalorder %v537_v31, 3 }
  0xf9   : > { %v543_v56 = vor.u32 %v542_v49, %v541_v38  ;;  %v546_v57 = vor.u32 %v545_v50, %v544_v42  ;;  %v549_v58 = vor.u32 %v548_v51, %v547_v44  ;;  %vm559_vm8 = vcmp.lt.s32.totalorder %v537_v31, 4 }
  0xfa   : > { %v552_v60 = vor.u32 %v551_v53, %v550_v46  ;;  %v555_v61 = vor.u32 %v554_v55, %v553_v48  ;;  %v438_v5 = vshll.u32 %v1653_v37, %v435_v40  ;;  %v439_v8 = vshrl.u32 %v1654_v41, %v436_v59 }
  0xfb   : > { %v560_v62 = vsel %vm556_vm5, %v540_v52, %v543_v56  ;;  %v561_v63 = vsel %vm559_vm8, %v549_v58, 2102212464  ;;  %v564_v0 = vsel %vm556_vm5, %v543_v56, %v546_v57  ;;  %v568_v1 = vsel %vm556_vm5, %v546_v57, %v549_v58 }
  0xfc   : > { %v562_v2 = vsel %vm558_vm7, %v546_v57, %v561_v63  ;;  %v565_v3 = vsel %vm559_vm8, %v552_v60, 920167782  ;;  %v569_v4 = vsel %vm559_vm8, %v555_v61, 1326507024  ;;  %v441_v9 = vshll.u32 %v1654_v41, %v435_v40 }
  0xfd   : > { %v566_v6 = vsel %vm558_vm7, %v549_v58, %v565_v3  ;;  %v570_v7 = vsel %vm558_vm7, %v552_v60, %v569_v4  ;;  %v563_v10 = vsel %vm557_vm6, %v560_v62, %v562_v2  ;;  %v442_v13 = vshrl.u32 %v1655_v43, %v436_v59 }
  0xfe   : > { %v567_v11 = vsel %vm557_vm6, %v564_v0, %v566_v6  ;;  %v571_v12 = vsel %vm557_vm6, %v568_v1, %v570_v7  ;;  %v440_v21 = vor.u32 %v439_v8, %v438_v5  ;;  %v444_v24 = vshll.u32 %v1655_v43, %v435_v40 }
  0xff   : > { %v1789_v14 = vmul.u32.u64.low %v1777_v34, %v571_v12  ;;  %v1790_v17 = vmul.u32.u64.high %v1777_v34, %v571_v12, %v1789_v14  ;;  %v1793_v19 = vmul.u32.u64.low %v1777_v34, %v567_v11  ;;  %v1794_v20 = vmul.u32.u64.high %v1777_v34, %v567_v11, %v1793_v19 }
 0x100   : > { %v443_v23 = vor.u32 %v442_v13, %v441_v9  ;;  %v445_v25 = vshrl.u32 %v1656_v45, %v436_v59  ;;  %v447_v26 = vshll.u32 %v1656_v45, %v435_v40  ;;  %v448_v27 = vshrl.u32 %v1657_v47, %v436_v59 }
 0x101   : > { %v451_v28 = vshrl.u32 %v1658_v54, %v436_v59  ;;  %v579_v30 = vmul.u32 %v1777_v34, %v563_v10  ;;  %v437_v31 = vshrl.u32 %v1653_v37, %v436_v59  ;;  %v450_v33 = vshll.u32 %v1657_v47, %v435_v40 }
 0x102   : > { %v446_v32 = vor.u32 %v445_v25, %v444_v24  ;;  %vm581_vm9 = vc.u32 %v1790_v17, %v1793_v19  ;;  %v582_v36 = vadd.s32 1, %v1794_v20  ;;  %v449_v38 = vor.u32 %v448_v27, %v447_v26 }
 0x103   : > { %vm453_vm10 = vcmp.lt.s32.totalorder %v1780_v39, 1  ;;  %v452_v41 = vor.u32 %v451_v28, %v450_v33  ;;  %vm455_vm11 = vcmp.lt.s32.totalorder %v1780_v39, 3  ;;  %vm456_vm12 = vcmp.lt.s32.totalorder %v1780_v39, 4 }
 0x104   : > { %v461_v42 = vsel %vm453_vm10, %v440_v21, %v443_v23  ;;  %v583_v35 = vsel %vm581_vm9, %v582_v36, %v1794_v20  ;;  %v458_v43 = vsel %vm456_vm12, %v446_v32, 2102212464  ;;  %v462_v34 = vsel %vm456_vm12, %v449_v38, 920167782 }
 0x105   : > { %v465_v37 = vsel %vm453_vm10, %v443_v23, %v446_v32  ;;  %v584_v44 = vadd.s32 %v583_v35, %v579_v30  ;;  %vm454_vm13 = vcmp.lt.s32.totalorder %v1780_v39, 2  ;;  %v463_v40 = vsel %vm455_vm11, %v446_v32, %v462_v34 }
 0x106   : > { %v466_v45 = vsel %vm456_vm12, %v452_v41, 1326507024  ;;  %v457_v46 = vsel %vm453_vm10, %v437_v31, %v440_v21  ;;  %v459_v47 = vsel %vm455_vm11, %v443_v23, %v458_v43  ;;  %v464_v48 = vsel %vm454_vm13, %v461_v42, %v463_v40 }
 0x107   : > { %v467_v49 = vsel %vm455_vm11, %v449_v38, %v466_v45  ;;  %v585_v50 = vadd.s32 536870912, %v584_v44  ;;  %v1804_v52 = vmul.u32.u64.low %v469_v29, %v464_v48  ;;  %v1805_v53 = vmul.u32.u64.high %v469_v29, %v464_v48, %v1804_v52 }
 0x108   : > { %v468_v51 = vsel %vm454_vm13, %v465_v37, %v467_v49  ;;  %v460_v57 = vsel %vm454_vm13, %v457_v46, %v459_v47  ;;  %v580_v9 = vadd.s32 %v1793_v19, %v1790_v17  ;;  %vm422_vm5 = vcmp.le.f32.partialorder %v421_v22, 0.7853982 }
 0x109   : > { %v1807_v54 = vmul.u32.u64.low %v469_v29, %v468_v51  ;;  %v1808_v55 = vmul.u32.u64.high %v469_v29, %v468_v51, %v1807_v54  ;;  %v586_v56 = vshrl.u32 %v585_v50, 30  ;;  %v479_v59 = vadd.s32 1, %v1805_v53 }
 0x10a   : > { %v476_v39 = vmul.u32 %v469_v29, %v460_v57  ;;  %vm616_vm10 = vweird.f32 %v1763_v15 }
 0x10b   : > { %v587_v58 = vshll.u32 %v586_v56, 30  ;;  %vm478_vm14 = vc.u32 %v1808_v55, %v1804_v52  ;;  %v477_v30 = vadd.s32 %v1804_v52, %v1808_v55  ;;  %v610_v43 = vsub.s32 4, %v586_v56 }
 0x10c   : > { %v480_v61 = vsel %vm478_vm14, %v479_v59, %v1805_v53 }
 0x10d   : > { %v588_v60 = vsub.s32 %v584_v44, %v587_v58  ;;  %v481_v62 = vadd.s32 %v480_v61, %v476_v39  ;;  %v611_v45 = vsel %vm526_vm1, %v610_v43, %v586_v56 }
 0x10e   : > { %v613_v48 = vsel %vm525_vm3, 0, %v611_v45 }
 0x10f   : > { %v590_v63 = vsub.s32 0, %v588_v60  ;;  %v482_v0 = vadd.s32 536870912, %v481_v62  ;;  %v828_v52 = vadd.s32 3, %v613_v48  ;;  %v617_v56 = vand.u32 3, %v613_v48 }
 0x111   : > { %v1446_v1 = vmin.u32 %v590_v63, %v588_v60  ;;  %v483_v2 = vshrl.u32 %v482_v0, 30  ;;  %v829_v58 = vand.u32 3, %v828_v52  ;;  %vm619_vm6 = vcmp.eq.s32.totalorder %v617_v56, 0 }
 0x112   : > { %vm622_vm7 = vcmp.eq.s32.totalorder %v617_v56, 2  ;;  %vm618_vm11 = vcmp.lt.s32.totalorder %v617_v56, 2 }
 0x113   : > { %v592_v3 = vclz %v1446_v1  ;;  %v484_v4 = vshll.u32 %v483_v2, 30  ;;  %v507_v46 = vsub.s32 4, %v483_v2  ;;  %vm831_vm8 = vcmp.eq.s32.totalorder %v829_v58, 0 }
 0x114   : > { %vm834_vm9 = vcmp.eq.s32.totalorder %v829_v58, 2  ;;  %vm830_vm12 = vcmp.lt.s32.totalorder %v829_v58, 2 }
 0x115   : > { %v1447_v5 = vadd.s32 4294967294, %v592_v3  ;;  %v485_v6 = vsub.s32 %v481_v62, %v484_v4  ;;  %v508_v50 = vsel %vm423_vm4, %v507_v46, %v483_v2 }
 0x116   : > { %v510_v53 = vsel %vm422_vm5, 0, %v508_v50 }
 0x117   : > { %vm1448_vm15 = vcmp.lt.s32.totalorder %v1447_v5, 0  ;;  %v487_v8 = vsub.s32 0, %v485_v6  ;;  %v724_v57 = vadd.s32 3, %v510_v53 }
 0x118   : > { %v595_v7 = vsel %vm1448_vm15, 0, %v1447_v5 }
 0x119   : > { %v596_v10 = vsub.s32 32, %v595_v7  ;;  %v600_v11 = vsub.s32 4294967266, %v595_v7  ;;  %v1442_v12 = vmin.u32 %v487_v8, %v485_v6  ;;  %v597_v13 = vshll.u32 %v588_v60, %v595_v7 }
 0x11a   : > { %v514_v60 = vand.u32 3, %v510_v53  ;;  %v725_v61 = vand.u32 3, %v724_v57 }
 0x11b   : > { %v598_v14 = vshrl.u32 %v580_v9, %v596_v10  ;;  %v601_v20 = vadd.s32 127, %v600_v11  ;;  %v489_v21 = vclz %v1442_v12 }
 0x11c   : > { %vm515_vm13 = vcmp.lt.s32.totalorder %v514_v60, 2  ;;  %vm516_vm14 = vcmp.eq.s32.totalorder %v514_v60, 0  ;;  %vm519_vm15 = vcmp.eq.s32.totalorder %v514_v60, 2 }
 0x11d   : > { %v599_v23 = vor.u32 %v598_v14, %v597_v13  ;;  %v602_v24 = vshll.u32 %v601_v20, 23  ;;  %v1443_v25 = vadd.s32 4294967294, %v489_v21 }
 0x11f   : > { %v603_v26 = vor.u32 4788187, %v602_v24  ;;  %vm1444_vm0 = vcmp.lt.s32.totalorder %v1443_v25, 0  ;;  %v606_v28 = vcvt.s32.f32 %v599_v23 }
 0x120   : > { %v492_v29 = vsel %vm1444_vm0, 0, %v1443_v25  ;;  %vm730_vm0 = vcmp.eq.s32.totalorder %v725_v61, 2  ;;  %v628_v25 = vld [vmem:[%s1905_s3 + $0x8] sm:$0xff] }
 0x121   : > { %v604_v27 = vand.u32 2147483647, %v603_v26  ;;  %v493_v31 = vsub.s32 32, %v492_v29  ;;  %v497_v32 = vsub.s32 4294967266, %v492_v29  ;;  %v494_v19 = vshll.u32 %v485_v6, %v492_v29  ;;  %v417_v26 = vld [vmem:[%s1904_s2] sm:$0xff]  ;;  %v420_v29 = vld [vmem:[%s1904_s2 + $0x18] sm:$0xff] }
 0x123   : > { %v607_v17 = vmul.f32 %v606_v28, %v604_v27  ;;  %v495_v33 = vshrl.u32 %v477_v30, %v493_v31  ;;  %v498_v36 = vadd.s32 127, %v497_v32  ;;  %v418_v27 = vld [vmem:[%s1904_s2 + $0x8] sm:$0xff]  ;;  %v419_v28 = vld [vmem:[%s1904_s2 + $0x10] sm:$0xff]  ;;  %v1062_v30 = vld [vmem:[%s1907_s5] sm:$0xff]  ;;  %v1041_v31 = vpop.permute.xlu0 %1040  ;;  %v1051_v32 = vpop.permute.xlu1 %1050 }
 0x125   : > { %v608_v38 = vxor.u32 2147483648, %v607_v17  ;;  %v496_v41 = vor.u32 %v495_v33, %v494_v19  ;;  %v499_v42 = vshll.u32 %v498_v36, 23 }
 0x127   : > { %v609_v35 = vsel %vm526_vm1, %v608_v38, %v607_v17  ;;  %v500_v37 = vor.u32 4788187, %v499_v42  ;;  %v503_v40 = vcvt.s32.f32 %v496_v41  ;;  %vm726_vm1 = vcmp.lt.s32.totalorder %v725_v61, 2  ;;  %v1046_v17 = vpop.permute.xlu0 %1045  ;;  %v1056_v42 = vpop.permute.xlu1 %1055 }
 0x128   : > { %v612_v34 = vsel %vm525_vm3, %v1763_v15, %v609_v35  ;;  %vm727_vm3 = vcmp.eq.s32.totalorder %v725_v61, 0  ;;  %v629_v15 = vld [vmem:[%s1905_s3 + $0x10] sm:$0xff] }
 0x129   : > { %1604 = vcosq.f32 %v612_v34  ;;  %v501_v44 = vand.u32 2147483647, %v500_v37 }
 0x12a   : > { %1606 = vsinq.f32 %v612_v34 }
 0x12b   : > { %v504_v47 = vmul.f32 %v503_v40, %v501_v44 }
 0x12d   : > { %v505_v49 = vxor.u32 2147483648, %v504_v47 }
 0x12f   : > { %v506_v16 = vsel %vm423_vm4, %v505_v49, %v504_v47  ;;  %vm513_vm4 = vweird.f32 %v1767_v18 }
 0x130   : > { %v509_v51 = vsel %vm422_vm5, %v1767_v18, %v506_v16  ;;  %v630_v18 = vld [vmem:[%s1905_s3 + $0x18] sm:$0xff]  ;;  %vm1146_vm5 = vcmask 261120  }
 0x131   : > { %1608 = vcosq.f32 %v509_v51  ;;  %1533 = vmatprep.mubr.msk.f32.mxu0 %vm1146_vm5, %v1062_v30  ;;  %v1064_v30 = vld [vmem:[%s1907_s5 + $0x10] sm:$0xff] }
 0x132   : > { %1610 = vsinq.f32 %v509_v51 }
 0x133   : > { %v1605_v54 = vpop.eup %1604 }
 0x134   : > { %v1607_v55 = vpop.eup %1606  ;;  %v623_v39 = vxor.u32 2147483648, %v1605_v54 }
 0x135   : > { %v620_v59 = vxor.u32 2147483648, %v1607_v55 }
 0x136   : > { %v624_v62 = vsel %vm622_vm7, %v623_v39, %v1607_v55  ;;  %v836_v0 = vsel %vm834_vm9, %v623_v39, %v1607_v55 }
 0x137   : > { %v621_v22 = vsel %vm619_vm6, %v1605_v54, %v620_v59  ;;  %v833_v63 = vsel %vm831_vm8, %v1605_v54, %v620_v59 }
 0x138   : > { %v625_v4 = vsel %vm618_vm11, %v621_v22, %v624_v62  ;;  %v837_v5 = vsel %vm830_vm12, %v833_v63, %v836_v0 }
 0x139   : > { %v626_v10 = vsel %vm616_vm10, nan, %v625_v4  ;;  %v838_v12 = vsel %vm616_vm10, nan, %v837_v5 }
 0x13b   : > { %v1609_v1 = vpop.eup %1608 }
 0x13c   : > { %v1611_v2 = vpop.eup %1610  ;;  %v520_v3 = vxor.u32 2147483648, %v1609_v1 }
 0x13d   : > { %v517_v6 = vxor.u32 2147483648, %v1611_v2 }
 0x13e   : > { %v521_v7 = vsel %vm519_vm15, %v520_v3, %v1611_v2  ;;  %v732_v8 = vsel %vm730_vm0, %v520_v3, %v1611_v2 }
 0x13f   : > { %v518_v9 = vsel %vm516_vm14, %v1609_v1, %v517_v6  ;;  %v729_v11 = vsel %vm727_vm3, %v1609_v1, %v517_v6 }
 0x140   : > { %v522_v13 = vsel %vm515_vm13, %v518_v9, %v521_v7  ;;  %v733_v14 = vsel %vm726_vm1, %v729_v11, %v732_v8  ;;  %vm1660_vm13 = vmmov 0  }
 0x141   : > { %v523_v20 = vsel %vm513_vm4, nan, %v522_v13  ;;  %v734_v21 = vsel %vm513_vm4, nan, %v733_v14 }
 0x142   : > { %v1550_v23 = vpack.c.bf16 %v838_v12, %v734_v21  ;;  %v1554_v24 = vpack.c.bf16 %v626_v10, %v523_v20 }
 0x144   : > { %1551 = vmatprep.subr.bf16.mxu1 %v1550_v23 }
 0x145   : > { %1553 = vmatpush3.bf16.msra.mxu1 %v1550_v23 }
 0x146   : > { %1555 = vmatprep.subr.bf16.mxu1 %v1554_v24 }
 0x148   : > { %1510 = vmatmul.mubr.msk.f32.vlgmr.msra.gmra.mrb[0].mxu1 %vm839_vm2, %v628_v25 }
 0x149   : > { %1557 = vmatpush3.bf16.msra.mxu1 %v1554_v24  ;;  %1512 = vmatprep.mubr.msk.f32.mxu1 %vm839_vm2, %v629_v15 }
 0x14c   : > { %1513 = vmatmul.mubr.msk.f32.gmra.mrb[2].mxu1 %vm839_vm2, %v630_v18 }
 0x14d   : > { %1519 = vmatprep.mubr.msk.f32.mxu1 %vm839_vm2, %v417_v26 }
 0x150   : > { %1520 = vmatmul.mubr.msk.f32.vlgmr.msra.gmra.mrb[0].mxu1 %vm839_vm2, %v418_v27 }
 0x151   : > { %1522 = vmatprep.mubr.msk.f32.mxu1 %vm839_vm2, %v419_v28 }
 0x154   : > { %1523 = vmatmul.mubr.msk.f32.gmra.mrb[2].mxu1 %vm839_vm2, %v420_v29  ;;  %v1063_v29 = vld [vmem:[%s1907_s5 + $0x8] sm:$0xff] }
 0x223   : > { %v1521_v19 = vpop.f32.mrb[0].mxu1 }
 0x224   : > { %v1059_v33 = vadd.f32 %v1521_v19, %v1046_v17  ;;  %v1015_v36 = vpop.f32.mrb[1].mxu1  ;;  %v1661_v17 = vmov 0.0   ;;  %v1134_v19 = vpop.permute.xlu1 %1133 }
 0x225   : > { %v1058_v38 = vadd.f32 %v1041_v31, %v1015_v36  ;;  %v1065_v31 = vld [vmem:[%s1907_s5 + $0x18] sm:$0xff] }
 0x226   : > { %v1071_v41 = vmin.f32 %v1059_v33, 20.0  ;;  %vm1075_vm6 = vcmp.gt.f32.partialorder %v1059_v33, 20.0 }
 0x227   : > { %v1070_v35 = vmin.f32 %v1058_v38, 20.0  ;;  %v1524_v43 = vpop.f32.mrb[2].mxu1  ;;  %vm1074_vm8 = vcmp.gt.f32.partialorder %v1058_v38, 20.0 }
 0x228   : > { %v1080_v34 = vmul.f32 1.442695, %v1071_v41  ;;  %v1862_v37 = vadd.f32 %v1524_v43, %v1056_v42  ;;  %v1025_v44 = vpop.f32.mrb[3].mxu1  ;;  %v1144_v43 = vpop.permute.xlu1 %1143 }
 0x229   : > { %v1078_v40 = vmul.f32 1.442695, %v1070_v35  ;;  %v1864_v45 = vadd.f32 %v1051_v32, %v1025_v44  ;;  %v1659_v32 = vmov 0.0|0.0  }
 0x22a   : > { %1612 = vpow2.f32 %v1080_v34  ;;  %v1073_v46 = vmin.f32 %v1862_v37, 20.0  ;;  %vm1077_vm10 = vcmp.gt.f32.partialorder %v1862_v37, 20.0 }
 0x22b   : > { %1614 = vpow2.f32 %v1078_v40  ;;  %v1072_v47 = vmin.f32 %v1864_v45, 20.0  ;;  %vm1076_vm12 = vcmp.gt.f32.partialorder %v1864_v45, 20.0 }
 0x22c   : > { %v1084_v48 = vmul.f32 1.442695, %v1073_v46 }
 0x22d   : > { %v1082_v49 = vmul.f32 1.442695, %v1072_v47 }
 0x22e   : > { %1616 = vpow2.f32 %v1084_v48 }
 0x22f   : > { %1618 = vpow2.f32 %v1082_v49 }
 0x234   : > { %v1613_v50 = vpop.eup %1612 }
 0x235   : > { %v1615_v16 = vpop.eup %1614  ;;  %v1095_v51 = vadd.f32 1.0, %v1613_v50  ;;  %v1098_v56 = vmul.f32 -0.5, %v1613_v50  ;;  %v1101_v39 = vand.u32 2147483647, %v1613_v50 }
 0x236   : > { %v1086_v52 = vadd.f32 1.0, %v1615_v16  ;;  %v1089_v58 = vmul.f32 -0.5, %v1615_v16  ;;  %v1092_v62 = vand.u32 2147483647, %v1615_v16 }
 0x237   : > { %1620 = vlog2.f32 %v1095_v51  ;;  %v1099_v59 = vadd.f32 1.0, %v1098_v56  ;;  %vm1102_vm2 = vcmp.lt.f32.partialorder %v1101_v39, 0.0004427343 }
 0x238   : > { %v1617_v53 = vpop.eup %1616  ;;  %1622 = vlog2.f32 %v1086_v52  ;;  %v1090_v61 = vadd.f32 1.0, %v1089_v58  ;;  %vm1093_vm7 = vcmp.lt.f32.partialorder %v1092_v62, 0.0004427343 }
 0x239   : > { %v1619_v54 = vpop.eup %1618  ;;  %v1113_v55 = vadd.f32 1.0, %v1617_v53  ;;  %v1116_v60 = vmul.f32 -0.5, %v1617_v53  ;;  %v1100_v2 = vmul.f32 %v1613_v50, %v1099_v59  ;;  %v1119_v7 = vand.u32 2147483647, %v1617_v53 }
 0x23a   : > { %v1104_v57 = vadd.f32 1.0, %v1619_v54  ;;  %v1107_v22 = vmul.f32 -0.5, %v1619_v54  ;;  %v1091_v5 = vmul.f32 %v1615_v16, %v1090_v61  ;;  %v1110_v9 = vand.u32 2147483647, %v1619_v54 }
 0x23b   : > { %1624 = vlog2.f32 %v1113_v55  ;;  %v1117_v3 = vadd.f32 1.0, %v1116_v60  ;;  %vm1120_vm9 = vcmp.lt.f32.partialorder %v1119_v7, 0.0004427343 }
 0x23c   : > { %1626 = vlog2.f32 %v1104_v57  ;;  %v1108_v6 = vadd.f32 1.0, %v1107_v22  ;;  %vm1111_vm11 = vcmp.lt.f32.partialorder %v1110_v9, 0.0004427343 }
 0x23d   : > { %v1118_v21 = vmul.f32 %v1617_v53, %v1117_v3 }
 0x23e   : > { %v1109_v25 = vmul.f32 %v1619_v54, %v1108_v6 }
 0x241   : > { %v1621_v63 = vpop.eup %1620 }
 0x242   : > { %v1623_v0 = vpop.eup %1622  ;;  %v1097_v1 = vmul.f32 0.6931472, %v1621_v63 }
 0x243   : > { %v1088_v4 = vmul.f32 0.6931472, %v1623_v0 }
 0x244   : > { %v1103_v8 = vsel %vm1102_vm2, %v1100_v2, %v1097_v1 }
 0x245   : > { %v1625_v10 = vpop.eup %1624  ;;  %v1094_v11 = vsel %vm1093_vm7, %v1091_v5, %v1088_v4  ;;  %v1123_v12 = vsel %vm1075_vm6, %v1059_v33, %v1103_v8  ;;  %v1129_v33 = vpop.permute.xlu0 %1128 }
 0x246   : > { %v1627_v13 = vpop.eup %1626  ;;  %v1122_v14 = vsel %vm1074_vm8, %v1058_v38, %v1094_v11  ;;  %v1115_v20 = vmul.f32 0.6931472, %v1625_v10 }
 0x247   : > { %v1558_v23 = vpack.c.bf16 %v1123_v12, %v1122_v14  ;;  %v1106_v24 = vmul.f32 0.6931472, %v1627_v13 }
 0x248   : > { %v1121_v15 = vsel %vm1120_vm9, %v1118_v21, %v1115_v20 }
 0x249   : > { %1559 = vmatprep.subr.bf16.mxu0 %v1558_v23  ;;  %v1112_v18 = vsel %vm1111_vm11, %v1109_v25, %v1106_v24  ;;  %v1125_v26 = vsel %vm1077_vm10, %v1862_v37, %v1121_v15  ;;  %v1139_v44 = vpop.permute.xlu0 %1138 }
 0x24a   : > { %1561 = vmatpush3.bf16.msra.mxu0 %v1558_v23  ;;  %v1124_v27 = vsel %vm1076_vm12, %v1864_v45, %v1112_v18 }
 0x24b   : > { %v1562_v28 = vpack.c.bf16 %v1125_v26, %v1124_v27 }
 0x24d   : > { %1563 = vmatprep.subr.bf16.mxu0 %v1562_v28 }
 0x24e   : > { %1565 = vmatpush3.bf16.msra.mxu0 %v1562_v28 }
 0x24f   : > { %1566 = vmatprep.subr.bf16.mxu0 %v1659_v32 }
 0x251   : > { %1534 = vmatmul.mubr.msk.f32.vlgmr.msra.gmra.mrb[2].mxu0 %vm1146_vm5, %v1063_v29 }
 0x252   : > { %1536 = vmatprep.mubr.msk.f32.mxu0 %vm1146_vm5, %v1064_v30 }
 0x255   : > { %1537 = vmatmul.mubr.msk.f32.gmra.mrb[4].mxu0 %vm1146_vm5, %v1065_v31 }
 0x256   : > { %1547 = vmatprep.mubr.msk.f32.mxu0 %vm1660_vm13, %v1661_v17  ;;  %v1244_v17 = vld [vmem:[%s1909_s7] sm:$0x1] }
 0x324   : > { %v1535_v36 = vpop.f32.mrb[2].mxu0 }
 0x325   : > { %v1231_v38 = vadd.f32 %v1535_v36, %v1134_v19  ;;  %v1225_v41 = vpop.f32.mrb[3].mxu0  ;;  %v1307_v19 = vlaneseq }
 0x326   : > { %v1226_v42 = vadd.f32 %v1225_v41, %v1129_v33 }
 0x327   : > { %v1247_v35 = vmin.f32 %v1231_v38, 20.0  ;;  %vm1251_vm15 = vcmp.gt.f32.partialorder %v1231_v38, 20.0  ;;  %v1308_v33 = vshrl.u32 %v1307_v19, 7 }
 0x328   : > { %v1246_v34 = vmin.f32 %v1226_v42, 20.0  ;;  %v1538_v37 = vpop.f32.mrb[4].mxu0  ;;  %vm1250_vm1 = vcmp.gt.f32.partialorder %v1226_v42, 20.0 }
 0x329   : > { %v1256_v40 = vmul.f32 1.442695, %v1247_v35  ;;  %v1241_v45 = vadd.f32 %v1538_v37, %v1144_v43  ;;  %v1235_v46 = vpop.f32.mrb[5].mxu0  ;;  %v1309_v36 = vsub.s32 0, %v1308_v33 }
 0x32a   : > { %v1254_v47 = vmul.f32 1.442695, %v1246_v34  ;;  %v1885_v48 = vadd.f32 %v1235_v46, %v1139_v44 }
 0x32b   : > { %1628 = vpow2.f32 %v1256_v40  ;;  %v1249_v49 = vmin.f32 %v1241_v45, 20.0  ;;  %vm1253_vm4 = vcmp.gt.f32.partialorder %v1241_v45, 20.0 }
 0x32c   : > { %1630 = vpow2.f32 %v1254_v47  ;;  %v1248_v50 = vmin.f32 %v1885_v48, 20.0  ;;  %vm1252_vm6 = vcmp.gt.f32.partialorder %v1885_v48, 20.0 }
 0x32d   : > { %v1260_v16 = vmul.f32 1.442695, %v1249_v49 }
 0x32e   : > { %v1258_v51 = vmul.f32 1.442695, %v1248_v50 }
 0x32f   : > { %1632 = vpow2.f32 %v1260_v16 }
 0x330   : > { %1634 = vpow2.f32 %v1258_v51 }
 0x335   : > { %v1629_v52 = vpop.eup %1628 }
 0x336   : > { %v1631_v53 = vpop.eup %1630  ;;  %v1271_v54 = vadd.f32 1.0, %v1629_v52  ;;  %v1274_v59 = vmul.f32 -0.5, %v1629_v52  ;;  %v1277_v22 = vand.u32 2147483647, %v1629_v52 }
 0x337   : > { %v1262_v55 = vadd.f32 1.0, %v1631_v53  ;;  %v1265_v60 = vmul.f32 -0.5, %v1631_v53  ;;  %v1268_v1 = vand.u32 2147483647, %v1631_v53 }
 0x338   : > { %1636 = vlog2.f32 %v1271_v54  ;;  %v1275_v61 = vadd.f32 1.0, %v1274_v59  ;;  %vm1278_vm14 = vcmp.lt.f32.partialorder %v1277_v22, 0.0004427343 }
 0x339   : > { %v1633_v56 = vpop.eup %1632  ;;  %1638 = vlog2.f32 %v1262_v55  ;;  %v1266_v63 = vadd.f32 1.0, %v1265_v60  ;;  %vm1269_vm0 = vcmp.lt.f32.partialorder %v1268_v1, 0.0004427343 }
 0x33a   : > { %v1635_v57 = vpop.eup %1634  ;;  %v1289_v58 = vadd.f32 1.0, %v1633_v56  ;;  %v1292_v62 = vmul.f32 -0.5, %v1633_v56  ;;  %v1276_v5 = vmul.f32 %v1629_v52, %v1275_v61  ;;  %v1295_v9 = vand.u32 2147483647, %v1633_v56 }
 0x33b   : > { %v1280_v39 = vadd.f32 1.0, %v1635_v57  ;;  %v1283_v0 = vmul.f32 -0.5, %v1635_v57  ;;  %v1267_v8 = vmul.f32 %v1631_v53, %v1266_v63  ;;  %v1286_v12 = vand.u32 2147483647, %v1635_v57 }
 0x33c   : > { %1640 = vlog2.f32 %v1289_v58  ;;  %v1293_v6 = vadd.f32 1.0, %v1292_v62  ;;  %vm1296_vm3 = vcmp.lt.f32.partialorder %v1295_v9, 0.0004427343 }
 0x33d   : > { %1642 = vlog2.f32 %v1280_v39  ;;  %v1284_v10 = vadd.f32 1.0, %v1283_v0  ;;  %vm1287_vm2 = vcmp.lt.f32.partialorder %v1286_v12, 0.0004427343 }
 0x33e   : > { %v1294_v25 = vmul.f32 %v1633_v56, %v1293_v6 }
 0x33f   : > { %v1285_v26 = vmul.f32 %v1635_v57, %v1284_v10 }
 0x342   : > { %v1637_v2 = vpop.eup %1636 }
 0x343   : > { %v1639_v3 = vpop.eup %1638  ;;  %v1273_v4 = vmul.f32 0.6931472, %v1637_v2 }
 0x344   : > { %v1264_v7 = vmul.f32 0.6931472, %v1639_v3 }
 0x345   : > { %v1279_v11 = vsel %vm1278_vm14, %v1276_v5, %v1273_v4 }
 0x346   : > { %v1641_v13 = vpop.eup %1640  ;;  %v1299_v14 = vsel %vm1251_vm15, %v1231_v38, %v1279_v11  ;;  %v1270_v20 = vsel %vm1269_vm0, %v1267_v8, %v1264_v7  ;;  %v1305_v38 = vpop.permute.xlu0 %1304 }
 0x347   : > { %v1643_v21 = vpop.eup %1642  ;;  %v1298_v23 = vsel %vm1250_vm1, %v1226_v42, %v1270_v20  ;;  %v1291_v24 = vmul.f32 0.6931472, %v1641_v13  ;;  %v1310_v41 = vrot.slane %v1305_v38, %v1309_v36 }
 0x348   : > { %v1567_v15 = vpack.c.bf16 %v1299_v14, %v1298_v23  ;;  %v1282_v18 = vmul.f32 0.6931472, %v1643_v21 }
 0x349   : > { %v1297_v27 = vsel %vm1296_vm3, %v1294_v25, %v1291_v24 }
 0x34a   : > { %v1301_v28 = vsel %vm1253_vm4, %v1241_v45, %v1297_v27  ;;  %v1288_v29 = vsel %vm1287_vm2, %v1285_v26, %v1282_v18  ;;  %1568 = vmatpush3.bf16.msra.mxu0 %v1567_v15 }
 0x34b   : > { %v1300_v30 = vsel %vm1252_vm6, %v1885_v48, %v1288_v29  ;;  %1569 = vmatprep.subr.bf16.mxu0 %v1659_v32 }
 0x34c   : > { %v1570_v31 = vpack.c.bf16 %v1301_v28, %v1300_v30 }
 0x34e   : > { %1571 = vmatpush3.bf16.msra.mxu0 %v1570_v31 }
 0x351   : > { %1548 = vmatmul.mubr.msk.f32.vlgmr.msra.gmra.mrb[6].mxu0 %vm1146_vm5, %v1244_v17 }
 0x424   : > { %v1380_v42 = vpop.f32.mrb[6].mxu0 }
 0x425   : > { %v1381_v35 = vadd.f32 %v1380_v42, %v1310_v41  ;;  %v1549_v32 = vpop.f32.mrb[7].mxu0 }
 0x427   : > { %1384 = vst [vmem:[%s327_s24] sm:$0x1] %v1381_v35 }
 0x428 PF: > { %s21_s11 = sadd.s32 1, %s1650_s11  }
 0x429   : > { %p18_p4 = scmp.ge.s32.totalorder %s21_s11, 4  }
 0x42b   :  { %20 = sbr.rel (!%p18_p4) target bundleno = 3 (0x3), region = 86 }

</bundles_post_ra>
